<compile_context>
chip_gen: v5e
topology: v5e:2x2
jax: 0.10.0
libtpu: 0.0.40
codegen_flags: <defaults>
</compile_context>

<pallas_src>
import functools
import math

import jax
import jax.numpy as jnp
from jax.experimental import pallas as pl
from jax.experimental.pallas import tpu as pltpu

# Keep f32 matmuls at full precision so the kernel matches the pure-JAX
# reference closely (semantic fidelity to the torch f32 module).
jax.config.update("jax_default_matmul_precision", "highest")


def _rgrnn_kernel(xproj_ref, eps_ref, whh_ref, wg_ref, bg_ref,
                  out_ref, h_scratch, *, hidden, time_block):
    """One grid step == `time_block` sequential time steps of the recurrence.

    Grid = (batch_blocks [parallel], time_blocks [arbitrary]).
      xproj_ref : (TB, BB, H)   precomputed x_t @ W_ih + b (time-major)
      eps_ref   : (TB, BB, H)   reparameterization noise
      whh_ref   : (H, H)
      wg_ref    : (H, 2H)       fused sampler Linear (cols [:H]=std-pre, [H:]=mu)
      bg_ref    : (1, 2H)
      out_ref   : (TB, BB, 3H)  concat(sample, mu, std) per step (single store)
      h_scratch : (BB, H)       recurrent hidden-state carry
    """
    H = hidden
    t_blk = pl.program_id(1)

    @pl.when(t_blk == 0)
    def _():
        h_scratch[...] = jnp.zeros_like(h_scratch)

    # Weights/bias loaded once per grid step (constant block index -> no
    # re-DMA between steps); hoisted out of the unrolled time loop.
    whh = whh_ref[...]
    wg = wg_ref[...]
    bg = bg_ref[...]

    h = h_scratch[...]
    # Static full unroll over the (small) time block — indices are
    # compile-time constants, so every slice/store is static.
    for i in range(time_block):
        # Elman RNN cell; x-projection and biases precomputed in the wrapper.
        pre = xproj_ref[i] + jnp.dot(h, whh, preferred_element_type=jnp.float32)
        out_h = jnp.tanh(pre)

        # Fused GaussianSampler Linear(H -> 2H): one MXU push per step.
        stats = jnp.dot(out_h, wg, preferred_element_type=jnp.float32) + bg
        std_pre = stats[:, :H]
        mu = stats[:, H:]
        # numerically stable softplus (== torch softplus, beta=1)
        std = jnp.maximum(std_pre, 0.0) + jnp.log1p(jnp.exp(-jnp.abs(std_pre)))

        # rsample: mu + std * eps
        sample = mu + std * eps_ref[i]

        # single lane-dense store of (sample | mu | std)
        out_ref[i] = jnp.concatenate([sample, mu, std], axis=-1)

        h = sample

    h_scratch[...] = h


def recursive_gaussian_rnn_forward(X, params, eps, *, time_block=8,
                                   batch_block=8):
    """X: int32 (B, T) token ids;  eps: f32 (B, T, H) standard-normal noise."""
    # Embedding lookup kept as glue (gather); padding_idx=0 row is zero.
    emb = jnp.take(params["embedding"], X, axis=0).astype(jnp.float32)  # (B,T,E)
    B, T, E = emb.shape
    H = params["W_hh"].shape[0]

    eps_f32 = eps.astype(jnp.float32)

    # --- hoisted input projection: one big parallel matmul --------------------
    xproj = (emb.reshape(B * T, E) @ params["W_ih"]
             + params["b_rnn"]).reshape(B, T, H)

    # --- time-major + pad (B -> multiple of 8 sublanes, T -> multiple of TB) --
    TB = max(1, min(time_block, T))
    BB = batch_block
    Tp = ((T + TB - 1) // TB) * TB
    Bp = ((B + BB - 1) // BB) * BB

    x_t = jnp.transpose(xproj, (1, 0, 2))                  # (T, B, H)
    e_t = jnp.transpose(eps_f32, (1, 0, 2))                # (T, B, H)
    x_t = jnp.pad(x_t, ((0, Tp - T), (0, Bp - B), (0, 0)))
    e_t = jnp.pad(e_t, ((0, Tp - T), (0, Bp - B), (0, 0)))

    grid = (Bp // BB, Tp // TB)   # (batch-parallel, time-sequential)

    kernel = functools.partial(_rgrnn_kernel, hidden=H, time_block=TB)

    grid_spec = pltpu.PrefetchScalarGridSpec(
        num_scalar_prefetch=0,
        grid=grid,
        in_specs=[
            pl.BlockSpec((TB, BB, H), lambda b, t: (t, b, 0)),      # xproj
            pl.BlockSpec((TB, BB, H), lambda b, t: (t, b, 0)),      # eps
            pl.BlockSpec((H, H), lambda b, t: (0, 0)),              # W_hh
            pl.BlockSpec((H, 2 * H), lambda b, t: (0, 0)),          # W_g (fused)
            pl.BlockSpec((1, 2 * H), lambda b, t: (0, 0)),          # b_g
        ],
        out_specs=pl.BlockSpec((TB, BB, 3 * H), lambda b, t: (t, b, 0)),
        scratch_shapes=[pltpu.VMEM((BB, H), jnp.float32)],          # h carry
    )

    out_t = pl.pallas_call(
        kernel,
        out_shape=jax.ShapeDtypeStruct((Tp, Bp, 3 * H), jnp.float32),
        grid_spec=grid_spec,
        compiler_params=pltpu.CompilerParams(
            # batch axis parallel (2 TCs on v7x), time axis sequential recurrence
            dimension_semantics=("parallel", "arbitrary")),
    )(x_t, e_t, params["W_hh"], params["W_g"], params["b_g"])

    # back to batch-first, drop padding, split the fused output
    out = jnp.transpose(out_t[:T, :B], (1, 0, 2))          # (B, T, 3H)
    h_seq = out[..., :H]
    h_mus = out[..., H:2 * H]
    h_stds = out[..., 2 * H:]

    # --- hoisted log-prob: Normal(mu, std).log_prob(mu + std*eps).sum(-1) -----
    log2pi = math.log(2.0 * math.pi)
    h_probs = (-0.5 * jnp.sum(eps_f32 * eps_f32, axis=-1)
               - jnp.sum(jnp.log(h_stds), axis=-1)
               - 0.5 * H * log2pi)                         # (B, T)

    # --- hoisted decoder: two large batched matmuls ----------------------------
    pre_logits = h_seq @ params["W_f"] + params["b_f"]     # (B, T, F)
    y_hat = pre_logits @ params["W_d"] + params["b_d"]     # (B, T, V)

    return y_hat, (h_mus, h_stds), h_seq, h_probs


# ----------------------- pure-JAX reference (for checking) -----------------------

def _reference_forward(X, params, eps):
    emb = jnp.take(params["embedding"], X, axis=0).astype(jnp.float32)
    B, T, _ = emb.shape
    H = params["W_hh"].shape[0]
    log2pi = math.log(2.0 * math.pi)
    h = jnp.zeros((B, H), jnp.float32)
    h_seq, h_mus, h_stds, h_probs = [], [], [], []
    for t in range(T):
        pre = emb[:, t] @ params["W_ih"] + params["b_rnn"] + h @ params["W_hh"]
        out_h = jnp.tanh(pre)
        stats = out_h @ params["W_g"] + params["b_g"]
        std = jax.nn.softplus(stats[:, :H])
        mu = stats[:, H:]
        e = eps[:, t].astype(jnp.float32)
        sample = mu + std * e
        lp = jnp.sum(-0.5 * e * e - jnp.log(std) - 0.5 * log2pi, axis=-1)
        h = sample
        h_seq.append(sample); h_mus.append(mu); h_stds.append(std); h_probs.append(lp)
    h_seq = jnp.stack(h_seq, axis=1)
    h_mus = jnp.stack(h_mus, axis=1)
    h_stds = jnp.stack(h_stds, axis=1)
    h_probs = jnp.stack(h_probs, axis=1)
    pre_logits = h_seq @ params["W_f"] + params["b_f"]
    y_hat = pre_logits @ params["W_d"] + params["b_d"]
    return y_hat, (h_mus, h_stds), h_seq, h_probs


# ----------------------- deterministic parameter init -----------------------

def _xavier_uniform(key, shape):
    fan_in, fan_out = shape[0], shape[1]
    limit = math.sqrt(6.0 / (fan_in + fan_out))
    return jax.random.uniform(key, shape, jnp.float32, -limit, limit)


def init_params(key, vocab_size, embedding_dim, hidden_size, final_layer_sz):
    keys = jax.random.split(key, 10)
    E, H, F, V = embedding_dim, hidden_size, final_layer_sz, vocab_size

    # Embedding ~ N(0,1), padding_idx=0 row zeroed (torch.nn.Embedding default)
    emb = jax.random.normal(keys[0], (V, E), jnp.float32)
    emb = emb.at[0].set(0.0)

    params = {
        "embedding": emb,
        # RGRNN weights: xavier_uniform, biases zeros (per init_weights);
        # b_rnn folds b_ih + b_hh.
        "W_ih": _xavier_uniform(keys[1], (E, H)),
        "W_hh": _xavier_uniform(keys[2], (H, H)),
        "b_rnn": jnp.zeros((1, H), jnp.float32),
        # GaussianSampler Linear(H, 2H): cols [:H] -> std-pre, [H:] -> mu.
        "W_g": _xavier_uniform(keys[3], (H, 2 * H)),
        "b_g": jnp.zeros((1, 2 * H), jnp.float32),
        # final_layer / decoder: torch Linear default init U(-1/sqrt(fan_in), .)
        "W_f": jax.random.uniform(keys[5], (H, F), jnp.float32,
                                  -1.0 / math.sqrt(H), 1.0 / math.sqrt(H)),
        "b_f": jax.random.uniform(keys[6], (1, F), jnp.float32,
                                  -1.0 / math.sqrt(H), 1.0 / math.sqrt(H)),
        "W_d": jax.random.uniform(keys[7], (F, V), jnp.float32,
                                  -1.0 / math.sqrt(F), 1.0 / math.sqrt(F)),
        "b_d": jax.random.uniform(keys[8], (1, V), jnp.float32,
                                  -1.0 / math.sqrt(F), 1.0 / math.sqrt(F)),
    }
    return params


if __name__ == "__main__":
    key = jax.random.PRNGKey(0)
    k_params, k_x, k_eps = jax.random.split(key, 3)

    B, T = 2, 8
    vocab_size, embedding_dim, hidden_size, final_layer_sz = 64, 16, 32, 16

    params = init_params(k_params, vocab_size, embedding_dim, hidden_size,
                         final_layer_sz)

    X = jax.random.randint(k_x, (B, T), 0, vocab_size, dtype=jnp.int32)
    # reparameterization noise for the Gaussian hidden-state sampler (rsample)
    eps = jax.random.normal(k_eps, (B, T, hidden_size), jnp.float32)

    # time_block=4 -> 2 sequential grid steps, exercising the hidden-state carry.
    y_hat, (h_mus, h_stds), h_seq, h_probs = recursive_gaussian_rnn_forward(
        X, params, eps, time_block=4, batch_block=8)
    jax.block_until_ready((y_hat, h_mus, h_stds, h_seq, h_probs))

    assert y_hat.shape == (B, T, vocab_size)
    assert h_seq.shape == (B, T, hidden_size)
    assert h_probs.shape == (B, T)
    assert h_mus.shape == (B, T, hidden_size)
    assert h_stds.shape == (B, T, hidden_size)

    # correctness check against a pure-JAX reference of the torch forward pass
    ry, (rmu, rstd), rseq, rprob = _reference_forward(X, params, eps)
    for got, want in [(y_hat, ry), (h_mus, rmu), (h_stds, rstd),
                      (h_seq, rseq), (h_probs, rprob)]:
        assert bool(jnp.allclose(got, want, rtol=2e-3, atol=2e-3))

    print("KERNEL_OK")
</pallas_src>

<mosaic_0001>
module attributes {stable_mosaic.version = 11 : i64} {
  func.func @_rgrnn_kernel(%arg0: i32, %arg1: i32, %arg2: memref<4x8x32xf32, #tpu.memory_space<vmem>>, %arg3: memref<4x8x32xf32, #tpu.memory_space<vmem>>, %arg4: memref<32x32xf32, #tpu.memory_space<vmem>>, %arg5: memref<32x64xf32, #tpu.memory_space<vmem>>, %arg6: memref<1x64xf32, #tpu.memory_space<vmem>>, %arg7: memref<4x8x96xf32, #tpu.memory_space<vmem>>, %arg8: memref<8x32xf32, #tpu.memory_space<vmem>>) attributes {dimension_semantics = [#tpu.dimension_semantics<parallel>, #tpu.dimension_semantics<arbitrary>], iteration_bounds = array<i64: 1, 2>, scalar_prefetch = 0 : i64, scratch_operands = 1 : i64, tpu.core_type = #tpu.core_type<tc>, window_params = [{transform_indices = @transform_0, window_bounds = array<i64: 4, 8, 32>}, {transform_indices = @transform_1, window_bounds = array<i64: 4, 8, 32>}, {pipeline_mode = #tpu.pipeline_mode<synchronous>, transform_indices = @transform_2, window_bounds = array<i64: 32, 32>}, {pipeline_mode = #tpu.pipeline_mode<synchronous>, transform_indices = @transform_3, window_bounds = array<i64: 32, 64>}, {pipeline_mode = #tpu.pipeline_mode<synchronous>, transform_indices = @transform_4, window_bounds = array<i64: 1, 64>}, {transform_indices = @transform_5, window_bounds = array<i64: 4, 8, 96>}]} {
    %c0_i32 = arith.constant 0 : i32
    %0 = arith.cmpi eq, %arg1, %c0_i32 : i32
    %1 = arith.extui %0 : i1 to i32
    %c0_i32_0 = arith.constant 0 : i32
    %2 = arith.cmpi ne, %1, %c0_i32_0 : i32
    scf.if %2 {
      %cst_58 = arith.constant 0.000000e+00 : f32
      %112 = vector.broadcast %cst_58 : f32 to vector<8x32xf32>
      %c0_59 = arith.constant 0 : index
      %c0_60 = arith.constant 0 : index
      %113 = vector.load %arg8[%c0_59, %c0_60] : memref<8x32xf32, #tpu.memory_space<vmem>>, vector<8x32xf32>
      tpu.vector_store %arg8[%c0_59, %c0_60], %112 {strides = array<i32>} : memref<8x32xf32, #tpu.memory_space<vmem>>, vector<8x32xf32>,
    } else {
    }
    %c0 = arith.constant 0 : index
    %c0_1 = arith.constant 0 : index
    %3 = vector.load %arg4[%c0, %c0_1] : memref<32x32xf32, #tpu.memory_space<vmem>>, vector<32x32xf32>
    %c0_2 = arith.constant 0 : index
    %c0_3 = arith.constant 0 : index
    %4 = vector.load %arg5[%c0_2, %c0_3] : memref<32x64xf32, #tpu.memory_space<vmem>>, vector<32x64xf32>
    %c0_4 = arith.constant 0 : index
    %c0_5 = arith.constant 0 : index
    %5 = vector.load %arg6[%c0_4, %c0_5] : memref<1x64xf32, #tpu.memory_space<vmem>>, vector<1x64xf32>
    %c0_6 = arith.constant 0 : index
    %c0_7 = arith.constant 0 : index
    %6 = vector.load %arg8[%c0_6, %c0_7] : memref<8x32xf32, #tpu.memory_space<vmem>>, vector<8x32xf32>
    %c0_8 = arith.constant 0 : index
    %c0_9 = arith.constant 0 : index
    %c0_10 = arith.constant 0 : index
    %7 = vector.load %arg2[%c0_8, %c0_9, %c0_10] : memref<4x8x32xf32, #tpu.memory_space<vmem>>, vector<1x8x32xf32>
    %8 = vector.shape_cast %7 : vector<1x8x32xf32> to vector<8x32xf32>
    %cst = arith.constant dense<0.000000e+00> : vector<8x32xf32>
    %9 = tpu.matmul %6, %3, %cst {dimension_numbers = #tpu.dot_dimension_numbers<[1], [0], [0], [1], [0, 0, 1, 1], [], []>, precision = #tpu.contract_precision<fp32>} : vector<8x32xf32>, vector<32x32xf32>, vector<8x32xf32> -> vector<8x32xf32>
    %10 = arith.addf %8, %9 : vector<8x32xf32>
    %11 = math.tanh %10 : vector<8x32xf32>
    %cst_11 = arith.constant dense<0.000000e+00> : vector<8x64xf32>
    %12 = tpu.matmul %11, %4, %cst_11 {dimension_numbers = #tpu.dot_dimension_numbers<[1], [0], [0], [1], [0, 0, 1, 1], [], []>, precision = #tpu.contract_precision<fp32>} : vector<8x32xf32>, vector<32x64xf32>, vector<8x64xf32> -> vector<8x64xf32>
    %13 = vector.broadcast %5 : vector<1x64xf32> to vector<8x64xf32>
    %14 = arith.addf %12, %13 : vector<8x64xf32>
    %15 = vector.extract_strided_slice %14 {offsets = [0, 0], sizes = [8, 32], strides = [1, 1]} : vector<8x64xf32> to vector<8x32xf32>
    %16 = vector.extract_strided_slice %14 {offsets = [0, 32], sizes = [8, 32], strides = [1, 1]} : vector<8x64xf32> to vector<8x32xf32>
    %cst_12 = arith.constant 0.000000e+00 : f32
    %17 = vector.broadcast %cst_12 : f32 to vector<8x32xf32>
    %18 = arith.maximumf %15, %17 : vector<8x32xf32>
    %19 = math.absf %15 : vector<8x32xf32>
    %cst_13 = arith.constant 0.000000e+00 : f32
    %20 = vector.broadcast %cst_13 : f32 to vector<8x32xf32>
    %21 = arith.subf %20, %19 : vector<8x32xf32>
    %22 = math.exp %21 : vector<8x32xf32>
    %23 = math.log1p %22 : vector<8x32xf32>
    %24 = arith.addf %18, %23 : vector<8x32xf32>
    %c0_14 = arith.constant 0 : index
    %c0_15 = arith.constant 0 : index
    %c0_16 = arith.constant 0 : index
    %25 = vector.load %arg3[%c0_14, %c0_15, %c0_16] : memref<4x8x32xf32, #tpu.memory_space<vmem>>, vector<1x8x32xf32>
    %26 = vector.shape_cast %25 : vector<1x8x32xf32> to vector<8x32xf32>
    %27 = arith.mulf %24, %26 : vector<8x32xf32>
    %28 = arith.addf %16, %27 : vector<8x32xf32>
    %29 = tpu.concatenate %28, %16, %24 in 1 : vector<8x32xf32>, vector<8x32xf32>, vector<8x32xf32> -> vector<8x96xf32>
    %c0_17 = arith.constant 0 : index
    %c0_18 = arith.constant 0 : index
    %c0_19 = arith.constant 0 : index
    %30 = vector.load %arg7[%c0_17, %c0_18, %c0_19] : memref<4x8x96xf32, #tpu.memory_space<vmem>>, vector<1x8x96xf32>
    %31 = vector.shape_cast %30 : vector<1x8x96xf32> to vector<8x96xf32>
    %32 = vector.shape_cast %29 : vector<8x96xf32> to vector<1x8x96xf32>
    tpu.vector_store %arg7[%c0_17, %c0_18, %c0_19], %32 {strides = array<i32>} : memref<4x8x96xf32, #tpu.memory_space<vmem>>, vector<1x8x96xf32>,
    %c1 = arith.constant 1 : index
    %c0_20 = arith.constant 0 : index
    %c0_21 = arith.constant 0 : index
    %33 = vector.load %arg2[%c1, %c0_20, %c0_21] : memref<4x8x32xf32, #tpu.memory_space<vmem>>, vector<1x8x32xf32>
    %34 = vector.shape_cast %33 : vector<1x8x32xf32> to vector<8x32xf32>
    %cst_22 = arith.constant dense<0.000000e+00> : vector<8x32xf32>
    %35 = tpu.matmul %28, %3, %cst_22 {dimension_numbers = #tpu.dot_dimension_numbers<[1], [0], [0], [1], [0, 0, 1, 1], [], []>, precision = #tpu.contract_precision<fp32>} : vector<8x32xf32>, vector<32x32xf32>, vector<8x32xf32> -> vector<8x32xf32>
    %36 = arith.addf %34, %35 : vector<8x32xf32>
    %37 = math.tanh %36 : vector<8x32xf32>
    %cst_23 = arith.constant dense<0.000000e+00> : vector<8x64xf32>
    %38 = tpu.matmul %37, %4, %cst_23 {dimension_numbers = #tpu.dot_dimension_numbers<[1], [0], [0], [1], [0, 0, 1, 1], [], []>, precision = #tpu.contract_precision<fp32>} : vector<8x32xf32>, vector<32x64xf32>, vector<8x64xf32> -> vector<8x64xf32>
    %39 = vector.broadcast %5 : vector<1x64xf32> to vector<8x64xf32>
    %40 = arith.addf %38, %39 : vector<8x64xf32>
    %41 = vector.extract_strided_slice %40 {offsets = [0, 0], sizes = [8, 32], strides = [1, 1]} : vector<8x64xf32> to vector<8x32xf32>
    %42 = vector.extract_strided_slice %40 {offsets = [0, 32], sizes = [8, 32], strides = [1, 1]} : vector<8x64xf32> to vector<8x32xf32>
    %cst_24 = arith.constant 0.000000e+00 : f32
    %43 = vector.broadcast %cst_24 : f32 to vector<8x32xf32>
    %44 = arith.maximumf %41, %43 : vector<8x32xf32>
    %45 = math.absf %41 : vector<8x32xf32>
    %cst_25 = arith.constant 0.000000e+00 : f32
    %46 = vector.broadcast %cst_25 : f32 to vector<8x32xf32>
    %47 = arith.subf %46, %45 : vector<8x32xf32>
    %48 = math.exp %47 : vector<8x32xf32>
    %49 = math.log1p %48 : vector<8x32xf32>
    %50 = arith.addf %44, %49 : vector<8x32xf32>
    %c1_26 = arith.constant 1 : index
    %c0_27 = arith.constant 0 : index
    %c0_28 = arith.constant 0 : index
    %51 = vector.load %arg3[%c1_26, %c0_27, %c0_28] : memref<4x8x32xf32, #tpu.memory_space<vmem>>, vector<1x8x32xf32>
    %52 = vector.shape_cast %51 : vector<1x8x32xf32> to vector<8x32xf32>
    %53 = arith.mulf %50, %52 : vector<8x32xf32>
    %54 = arith.addf %42, %53 : vector<8x32xf32>
    %55 = tpu.concatenate %54, %42, %50 in 1 : vector<8x32xf32>, vector<8x32xf32>, vector<8x32xf32> -> vector<8x96xf32>
    %c1_29 = arith.constant 1 : index
    %c0_30 = arith.constant 0 : index
    %c0_31 = arith.constant 0 : index
    %56 = vector.load %arg7[%c1_29, %c0_30, %c0_31] : memref<4x8x96xf32, #tpu.memory_space<vmem>>, vector<1x8x96xf32>
    %57 = vector.shape_cast %56 : vector<1x8x96xf32> to vector<8x96xf32>
    %58 = vector.shape_cast %55 : vector<8x96xf32> to vector<1x8x96xf32>
    tpu.vector_store %arg7[%c1_29, %c0_30, %c0_31], %58 {strides = array<i32>} : memref<4x8x96xf32, #tpu.memory_space<vmem>>, vector<1x8x96xf32>,
    %c2 = arith.constant 2 : index
    %c0_32 = arith.constant 0 : index
    %c0_33 = arith.constant 0 : index
    %59 = vector.load %arg2[%c2, %c0_32, %c0_33] : memref<4x8x32xf32, #tpu.memory_space<vmem>>, vector<1x8x32xf32>
    %60 = vector.shape_cast %59 : vector<1x8x32xf32> to vector<8x32xf32>
    %cst_34 = arith.constant dense<0.000000e+00> : vector<8x32xf32>
    %61 = tpu.matmul %54, %3, %cst_34 {dimension_numbers = #tpu.dot_dimension_numbers<[1], [0], [0], [1], [0, 0, 1, 1], [], []>, precision = #tpu.contract_precision<fp32>} : vector<8x32xf32>, vector<32x32xf32>, vector<8x32xf32> -> vector<8x32xf32>
    %62 = arith.addf %60, %61 : vector<8x32xf32>
    %63 = math.tanh %62 : vector<8x32xf32>
    %cst_35 = arith.constant dense<0.000000e+00> : vector<8x64xf32>
    %64 = tpu.matmul %63, %4, %cst_35 {dimension_numbers = #tpu.dot_dimension_numbers<[1], [0], [0], [1], [0, 0, 1, 1], [], []>, precision = #tpu.contract_precision<fp32>} : vector<8x32xf32>, vector<32x64xf32>, vector<8x64xf32> -> vector<8x64xf32>
    %65 = vector.broadcast %5 : vector<1x64xf32> to vector<8x64xf32>
    %66 = arith.addf %64, %65 : vector<8x64xf32>
    %67 = vector.extract_strided_slice %66 {offsets = [0, 0], sizes = [8, 32], strides = [1, 1]} : vector<8x64xf32> to vector<8x32xf32>
    %68 = vector.extract_strided_slice %66 {offsets = [0, 32], sizes = [8, 32], strides = [1, 1]} : vector<8x64xf32> to vector<8x32xf32>
    %cst_36 = arith.constant 0.000000e+00 : f32
    %69 = vector.broadcast %cst_36 : f32 to vector<8x32xf32>
    %70 = arith.maximumf %67, %69 : vector<8x32xf32>
    %71 = math.absf %67 : vector<8x32xf32>
    %cst_37 = arith.constant 0.000000e+00 : f32
    %72 = vector.broadcast %cst_37 : f32 to vector<8x32xf32>
    %73 = arith.subf %72, %71 : vector<8x32xf32>
    %74 = math.exp %73 : vector<8x32xf32>
    %75 = math.log1p %74 : vector<8x32xf32>
    %76 = arith.addf %70, %75 : vector<8x32xf32>
    %c2_38 = arith.constant 2 : index
    %c0_39 = arith.constant 0 : index
    %c0_40 = arith.constant 0 : index
    %77 = vector.load %arg3[%c2_38, %c0_39, %c0_40] : memref<4x8x32xf32, #tpu.memory_space<vmem>>, vector<1x8x32xf32>
    %78 = vector.shape_cast %77 : vector<1x8x32xf32> to vector<8x32xf32>
    %79 = arith.mulf %76, %78 : vector<8x32xf32>
    %80 = arith.addf %68, %79 : vector<8x32xf32>
    %81 = tpu.concatenate %80, %68, %76 in 1 : vector<8x32xf32>, vector<8x32xf32>, vector<8x32xf32> -> vector<8x96xf32>
    %c2_41 = arith.constant 2 : index
    %c0_42 = arith.constant 0 : index
    %c0_43 = arith.constant 0 : index
    %82 = vector.load %arg7[%c2_41, %c0_42, %c0_43] : memref<4x8x96xf32, #tpu.memory_space<vmem>>, vector<1x8x96xf32>
    %83 = vector.shape_cast %82 : vector<1x8x96xf32> to vector<8x96xf32>
    %84 = vector.shape_cast %81 : vector<8x96xf32> to vector<1x8x96xf32>
    tpu.vector_store %arg7[%c2_41, %c0_42, %c0_43], %84 {strides = array<i32>} : memref<4x8x96xf32, #tpu.memory_space<vmem>>, vector<1x8x96xf32>,
    %c3 = arith.constant 3 : index
    %c0_44 = arith.constant 0 : index
    %c0_45 = arith.constant 0 : index
    %85 = vector.load %arg2[%c3, %c0_44, %c0_45] : memref<4x8x32xf32, #tpu.memory_space<vmem>>, vector<1x8x32xf32>
    %86 = vector.shape_cast %85 : vector<1x8x32xf32> to vector<8x32xf32>
    %cst_46 = arith.constant dense<0.000000e+00> : vector<8x32xf32>
    %87 = tpu.matmul %80, %3, %cst_46 {dimension_numbers = #tpu.dot_dimension_numbers<[1], [0], [0], [1], [0, 0, 1, 1], [], []>, precision = #tpu.contract_precision<fp32>} : vector<8x32xf32>, vector<32x32xf32>, vector<8x32xf32> -> vector<8x32xf32>
    %88 = arith.addf %86, %87 : vector<8x32xf32>
    %89 = math.tanh %88 : vector<8x32xf32>
    %cst_47 = arith.constant dense<0.000000e+00> : vector<8x64xf32>
    %90 = tpu.matmul %89, %4, %cst_47 {dimension_numbers = #tpu.dot_dimension_numbers<[1], [0], [0], [1], [0, 0, 1, 1], [], []>, precision = #tpu.contract_precision<fp32>} : vector<8x32xf32>, vector<32x64xf32>, vector<8x64xf32> -> vector<8x64xf32>
    %91 = vector.broadcast %5 : vector<1x64xf32> to vector<8x64xf32>
    %92 = arith.addf %90, %91 : vector<8x64xf32>
    %93 = vector.extract_strided_slice %92 {offsets = [0, 0], sizes = [8, 32], strides = [1, 1]} : vector<8x64xf32> to vector<8x32xf32>
    %94 = vector.extract_strided_slice %92 {offsets = [0, 32], sizes = [8, 32], strides = [1, 1]} : vector<8x64xf32> to vector<8x32xf32>
    %cst_48 = arith.constant 0.000000e+00 : f32
    %95 = vector.broadcast %cst_48 : f32 to vector<8x32xf32>
    %96 = arith.maximumf %93, %95 : vector<8x32xf32>
    %97 = math.absf %93 : vector<8x32xf32>
    %cst_49 = arith.constant 0.000000e+00 : f32
    %98 = vector.broadcast %cst_49 : f32 to vector<8x32xf32>
    %99 = arith.subf %98, %97 : vector<8x32xf32>
    %100 = math.exp %99 : vector<8x32xf32>
    %101 = math.log1p %100 : vector<8x32xf32>
    %102 = arith.addf %96, %101 : vector<8x32xf32>
    %c3_50 = arith.constant 3 : index
    %c0_51 = arith.constant 0 : index
    %c0_52 = arith.constant 0 : index
    %103 = vector.load %arg3[%c3_50, %c0_51, %c0_52] : memref<4x8x32xf32, #tpu.memory_space<vmem>>, vector<1x8x32xf32>
    %104 = vector.shape_cast %103 : vector<1x8x32xf32> to vector<8x32xf32>
    %105 = arith.mulf %102, %104 : vector<8x32xf32>
    %106 = arith.addf %94, %105 : vector<8x32xf32>
    %107 = tpu.concatenate %106, %94, %102 in 1 : vector<8x32xf32>, vector<8x32xf32>, vector<8x32xf32> -> vector<8x96xf32>
    %c3_53 = arith.constant 3 : index
    %c0_54 = arith.constant 0 : index
    %c0_55 = arith.constant 0 : index
    %108 = vector.load %arg7[%c3_53, %c0_54, %c0_55] : memref<4x8x96xf32, #tpu.memory_space<vmem>>, vector<1x8x96xf32>
    %109 = vector.shape_cast %108 : vector<1x8x96xf32> to vector<8x96xf32>
    %110 = vector.shape_cast %107 : vector<8x96xf32> to vector<1x8x96xf32>
    tpu.vector_store %arg7[%c3_53, %c0_54, %c0_55], %110 {strides = array<i32>} : memref<4x8x96xf32, #tpu.memory_space<vmem>>, vector<1x8x96xf32>,
    %c0_56 = arith.constant 0 : index
    %c0_57 = arith.constant 0 : index
    %111 = vector.load %arg8[%c0_56, %c0_57] : memref<8x32xf32, #tpu.memory_space<vmem>>, vector<8x32xf32>
    tpu.vector_store %arg8[%c0_56, %c0_57], %106 {strides = array<i32>} : memref<8x32xf32, #tpu.memory_space<vmem>>, vector<8x32xf32>,
    return
  }
  func.func @transform_0(%arg0: i32, %arg1: i32) -> (i32, i32, i32) {
    %c0_i32 = arith.constant 0 : i32
    %c0_i32_0 = arith.constant 0 : i32
    return %arg1, %arg0, %c0_i32 : i32, i32, i32
  }
  func.func @transform_1(%arg0: i32, %arg1: i32) -> (i32, i32, i32) {
    %c0_i32 = arith.constant 0 : i32
    %c0_i32_0 = arith.constant 0 : i32
    return %arg1, %arg0, %c0_i32 : i32, i32, i32
  }
  func.func @transform_2(%arg0: i32, %arg1: i32) -> (i32, i32) {
    %c0_i32 = arith.constant 0 : i32
    %c0_i32_0 = arith.constant 0 : i32
    %c0_i32_1 = arith.constant 0 : i32
    return %c0_i32, %c0_i32_0 : i32, i32
  }
  func.func @transform_3(%arg0: i32, %arg1: i32) -> (i32, i32) {
    %c0_i32 = arith.constant 0 : i32
    %c0_i32_0 = arith.constant 0 : i32
    %c0_i32_1 = arith.constant 0 : i32
    return %c0_i32, %c0_i32_0 : i32, i32
  }
  func.func @transform_4(%arg0: i32, %arg1: i32) -> (i32, i32) {
    %c0_i32 = arith.constant 0 : i32
    %c0_i32_0 = arith.constant 0 : i32
    %c0_i32_1 = arith.constant 0 : i32
    return %c0_i32, %c0_i32_0 : i32, i32
  }
  func.func @transform_5(%arg0: i32, %arg1: i32) -> (i32, i32, i32) {
    %c0_i32 = arith.constant 0 : i32
    %c0_i32_0 = arith.constant 0 : i32
    return %arg1, %arg0, %c0_i32 : i32, i32, i32
  }
}

</mosaic_0001>

<bundles_post_ra>
// kernel: tpu_custom_call.1
= control target key start
LH: loop header
LB: loop body
LE: loop exit
PB: predicated region body
PF: predicated region fallthrough
CT: control target
= control target key end

     0   :  { %s3146_s0 = inlined_call_operand.hbm [shape: f32[8,8,32], index: 0, kind: input, shape index: {}]   ;;  %s3147_s1 = inlined_call_operand.hbm [shape: f32[8,8,32], index: 1, kind: input, shape index: {}]   ;;  %s3148_s2 = inlined_call_operand.hbm [shape: f32[32,32], index: 2, kind: input, shape index: {}]   ;;  %s3149_s3 = inlined_call_operand.hbm [shape: f32[32,64], index: 3, kind: input, shape index: {}]   ;;  %s3150_s4 = inlined_call_operand.vmem [shape: f32[1,64], index: 4, kind: input, shape index: {}]   ;;  %s3151_s5 = inlined_call_operand.hbm [shape: f32[8,8,96], index: 5, kind: output, shape index: {}]  }
   0x1   :  { %3159 = sst [smem:[#allocation21_spill]] %s3148_s2 }
   0x2   :  { %3160 = sst [smem:[#allocation22_spill]] %s3149_s3 }
   0x3   :  { %10 = vsyncpa [#allocation4], 0 }
   0x4   :  { %12 = vsyncpa [#allocation4 + $0x1], 0 }
   0x5   :  { %13 = vsyncpa [#allocation7], 0 }
   0x6   :  { %15 = vsyncpa [#allocation7 + $0x1], 0 }
   0x7   :  { %16 = vsyncpa [#allocation10], 0 }
   0x8   :  { %17 = vsyncpa [#allocation5], 0 }
   0x9   :  { %19 = vsyncpa [#allocation5 + $0x1], 0  ;;  %s2579_s18 = smov 0   ;;  %s2581_s19 = smov 0  }
   0xa   :  { %s2583_s20 = smov 0   ;;  %s2585_s21 = smov 0  }
   0xb   :  { %s2587_s22 = smov 0   ;;  %s2589_s23 = smov 0  }
   0xc LB: > { %3161 = sst [smem:[#allocation17_spill]] %s2525_s20  ;;  %s2610_s24 = sadd.s32 4294967295, %s2537_s23   ;;  %s2537_s23 = sphi %s2589_s23, %s25_s23   ;;  %s2533_s22 = sphi %s2587_s22, %s3177_s22   ;;  %s2529_s21 = sphi %s2585_s21, %s3176_s21   ;;  %s2525_s20 = sphi %s2583_s20, %s3175_s20   ;;  %s2521_s19 = sphi %s2581_s19, %s3179_s19   ;;  %s2517_s18 = sphi %s2579_s18, %s3178_s18  }
   0xd   : > { %3162 = sst [smem:[#allocation18_spill]] %s2533_s22  ;;  %s2167_s25 = sadd.s32 4294967294, %s2537_s23  }
   0xe   : > { %p59_p0 = scmp.ne.s32.totalorder %s2521_s19, %s2517_s18  ;;  %p60_p1 = scmp.eq.s32.totalorder %s2610_s24, 0 }
   0xf   : > { %p176_p2 = scmp.eq.s32.totalorder %s2610_s24, 1  ;;  %p182_p3 = scmp.eq.s32.totalorder %s2167_s25, 1 }
  0x10   : > { %p2619_p4 = por %p60_p1, %p59_p0  ;;  %p2168_p5 = scmp.ge.s32.totalorder %s2537_s23, 1 }
  0x11   : > { %p2624_p6 = por %p182_p3, %p59_p0  ;;  %p189_p7 = scmp.lt.s32.totalorder %s2537_s23, 3 }
  0x12   : > { %s3165_s2 = sld [smem:[#allocation21_spill]]  ;;  %s2539_s7 = smov [#allocation8]  }
  0x13   : > { %p2632_p8 = pnand %p2168_p5, %p189_p7  ;;  %s202_s8 = sshll.u32 %s2539_s7, 4  ;;  %s203_s8 = int_to_ptr.vmem [resolvable:$true] %s202_s8 }
  0x14   : > { %p2171_p11 = scmp.ge.s32.totalorder %s2537_s23, 2  ;;  %s3167_s3 = sld [smem:[#allocation22_spill]] }
  0x15   : > { %p2216_p9 = pneg %p2632_p8  ;;  %s3152_s12 = smov 128  }
  0x16   : > { %s3154_s13 = smov 8   ;;  %s2542_s14 = smov [#allocation9]  }
  0x17   : > { %p2217_p10 = pnand %p2216_p9, %p60_p1  ;;  %s216_s15 = sshll.u32 %s2542_s14, 4  ;;  %s217_s15 = int_to_ptr.vmem [resolvable:$true] %s216_s15 }
  0x18   : > { %s200_s30 = sshll.u32 %s3165_s2, 4  ;;  %s34_s16 = sadd.s32 1, %s2533_s22  ;;  %s201_s30 = int_to_ptr.hbm [resolvable:$true] %s200_s30 }
  0x19   : > { %2219 = dma.hbm_to_vmem [thread:$0]  (!%p2217_p10), %s201_s30, 512, %s203_s8, [#allocation7], %s3152_s12, %s3152_s12, %s3154_s13  }
  0x1a   : > { %s214_s11 = sshll.u32 %s3167_s3, 4  ;;  %s46_s17 = sadd.s32 1, %s2525_s20  ;;  %s215_s11 = int_to_ptr.hbm [resolvable:$true] %s214_s11 }
  0x1b   : > { %2222 = dma.hbm_to_vmem [thread:$0]  (!%p2217_p10), %s215_s11, 512, %s217_s15, [#allocation10], %s3152_s12, %s3152_s12, %s3154_s13  }
  0x1c   : > { %p35_p12 = scmp.ge.s32.totalorder %s34_s16, 2  ;;  %p53_p13 = scmp.ne.s32.totalorder %s2525_s20, %s2521_s19 }
  0x1d   : > { %p54_p0 = scmp.eq.s32.totalorder %s2537_s23, 0  ;;  %p2236_p3 = scmp.lt.s32.totalorder %s2537_s23, 2 }
  0x1e   : > { %s3181_s16 = smov (%p35_p12, %s34_s16), 0  ;;  %p2664_p7 = por %p176_p2, %p53_p13 }
  0x1f   : > { %3168 = sst [smem:[#allocation19_spill]] %s3181_s16  ;;  %p2658_p5 = por %p54_p0, %p53_p13 }
  0x20   : > { %s41_s29 = ssub.s32 %s2533_s22, %s3181_s16  ;;  %s233_s30 = sand.u32 1, %s2525_s20  }
  0x21   : > { %p44_p9 = scmp.eq.s32.totalorder %s41_s29, 0  ;;  %s2172_s7 = sshll.u32 %s233_s30, 5 }
  0x22   : > { %s2199_s8 = sshll.u32 %s2533_s22, 5  ;;  %s237_s12 = scalar_lea.vmem [#allocation3], %s2172_s7 }
  0x23   : > { %s2673_s9 = scalar_select %p44_p9, %s2525_s20, %s46_s17  }
  0x24   : > { %s243_s14 = scalar_lea.hbm %s3146_s0, %s2199_s8  ;;  %s246_s13 = sshll.u32 %s237_s12, 4  ;;  %s247_s13 = int_to_ptr.vmem [resolvable:$true] %s246_s13 }
  0x25   : > { %3171 = sst [smem:[#allocation20_spill]] %s2673_s9  ;;  %s244_s15 = sshll.u32 %s243_s14, 4  ;;  %s245_s15 = int_to_ptr.hbm [resolvable:$true] %s244_s15 }
  0x26   : > { %p2224_p2 = pnand %p2236_p3, %p2658_p5  ;;  %s266_s29 = scalar_lea.hbm %s3147_s1, %s2199_s8 }
  0x27   : > { %s260_s16 = scalar_lea.vmem [#allocation6], %s2172_s7  ;;  %s267_s22 = sshll.u32 %s266_s29, 4  ;;  %s268_s22 = int_to_ptr.hbm [resolvable:$true] %s267_s22 }
  0x28   : > { %s269_s17 = sshll.u32 %s260_s16, 4  ;;  %s234_s9 = scalar_lea.sflag [#allocation4], %s233_s30  ;;  %s270_s17 = int_to_ptr.vmem [resolvable:$true] %s269_s17 }
  0x29   : > { %s3172_s20 = smov 8   ;;  %s3173_s10 = smov 128  }
  0x2a   : > { %2226 = dma.hbm_to_vmem [thread:$0]  (!%p2224_p2), %s245_s15, 512, %s247_s13, %s234_s9, %s3173_s10, %s3173_s10, %s3172_s20  }
  0x2b   : > { %s256_s12 = sand.u32 1, %s2537_s23   ;;  %281 = sbr.rel (%p2632_p8) target bundleno = 2333 (0x91d), region = 40 }
  0x2c   : > { %s257_s11 = scalar_lea.sflag [#allocation7], %s256_s12  ;;  %s2695_s2 = sand.u32 (!%p2632_p8), 1, %s2521_s19  }
  0x2d   : > { %2229 = dma.hbm_to_vmem [thread:$0]  (!%p2224_p2), %s268_s22, 512, %s270_s17, %s257_s11, %s3173_s10, %s3173_s10, %s3172_s20  }
  0x2e   : > { %s2179_s3 = sshll.u32 (!%p2632_p8), %s2695_s2, 5  ;;  %s284_s16 = scalar_lea.sflag (!%p2632_p8), [#allocation4], %s2695_s2 }
  0x2f   : > { %s2699_s13 = scalar_lea.vmem (!%p2632_p8), [#allocation3], %s2179_s3 }
  0x30   : > { %2496 = dma.done.wait (%p2619_p4), %s284_s16, 512  }
  0x31   : > { %2498 = vsyncadd (%p2619_p4), %s284_s16, 4294966784  ;;  %s293_s20 = sand.u32 1, %s2610_s24   ;;  %s2706_s6 = scalar_lea.vmem [#allocation6], %s2179_s3 }
  0x32   : > { %s294_s22 = scalar_lea.sflag [#allocation7], %s293_s20 }
  0x33   : > { %2500 = dma.done.wait (%p2619_p4), %s294_s22, 512  }
  0x34   : > { %2502 = vsyncadd (%p2619_p4), %s294_s22, 4294966784 }
  0x35   : > { %2504 = dma.done.wait (%p60_p1), [#allocation7], 512  }
  0x36   : > { %2506 = vsyncadd (%p60_p1), [#allocation7], 4294966784 }
  0x37   : > { %2508 = dma.done.wait (%p60_p1), [#allocation10], 512  }
  0x38   : > { %2510 = vsyncadd (%p60_p1), [#allocation10], 4294966784  ;;  %s2720_s25 = scalar_lea.vmem [#allocation11], %s2179_s3  ;;  %p2184_p8 = scmp.ne.s32.totalorder %s2529_s21, 0 }
  0x3a   : > { %346 = sbr.rel (%p2184_p8) target bundleno = 65 (0x41), region = 60 }
  0x3f   : > { %vm347_vm0 = vcmask 261120   ;;  %v2543_v0 = vmov 0.0  }
  0x40   : > { %348 = vst.msk [vmem:[#allocation2] sm:$0xff] %vm347_vm0, %v2543_v0 }
  0x41 PF: > { %v352_v1 = vld [vmem:[#allocation8 + $0x18] sm:$0xff]  ;;  %v351_v2 = vld [vmem:[#allocation8 + $0x10] sm:$0xff]  ;;  %v350_v3 = vld [vmem:[#allocation8 + $0x8] sm:$0xff]  ;;  %vm360_vm1 = vcmask 261120   ;;  %s2544_s30 = smov 32   ;;  %s2545_s7 = smov 96  }
  0x42   : > { %v2723_v4 = vand.u32 4294901760, %v352_v1  ;;  %v2725_v5 = vand.u32 4294901760, %v351_v2  ;;  %v2727_v6 = vand.u32 4294901760, %v350_v3  ;;  %v349_v7 = vld [vmem:[#allocation8] sm:$0xff]  ;;  %v356_v32 = vld [vmem:[#allocation9 + $0x18] sm:$0xff]  ;;  %v355_v34 = vld [vmem:[#allocation9 + $0x10] sm:$0xff] }
  0x43   : > { %v2729_v9 = vand.u32 4294901760, %v349_v7  ;;  %v2796_v33 = vand.u32 4294901760, %v356_v32  ;;  %v2801_v36 = vand.u32 4294901760, %v355_v34  ;;  %v354_v37 = vld [vmem:[#allocation9 + $0x8] sm:$0xff]  ;;  %v353_v41 = vld [vmem:[#allocation9] sm:$0xff]  ;;  %s2546_s8 = smov 64  }
  0x44   : > { %v2733_v11 = vsub.f32 %v352_v1, %v2723_v4  ;;  %377 = vmatpush.msra.mxu0 %v2723_v4  ;;  %v2737_v12 = vsub.f32 %v351_v2, %v2725_v5  ;;  %477 = vmatpush.msra.mxu3 %v2723_v4  ;;  %v2741_v13 = vsub.f32 %v350_v3, %v2727_v6  ;;  %v2812_v40 = vand.u32 4294901760, %v354_v37  ;;  %v359_v1 = vld [vmem:[%s2699_s13] sm:$0xff]  ;;  %s2201_s9 = sshll.u32 %s2529_s21, 5  ;;  %s2034_s17 = sshll.u32 %s2720_s25, 4  ;;  %s2035_s17 = int_to_ptr.vmem [resolvable:$true] %s2034_s17 }
  0x45   : > { %v2744_v15 = vsub.f32 %v349_v7, %v2729_v9  ;;  %v2799_v35 = vsub.f32 %v356_v32, %v2796_v33  ;;  %v2809_v39 = vsub.f32 %v355_v34, %v2801_v36  ;;  %v2825_v45 = vand.u32 4294901760, %v353_v41  ;;  %s2033_s29 = scalar_lea.hbm %s3151_s5, %s2201_s9  ;;  %s2021_s21 = scalar_lea.sflag [#allocation5], %s2695_s2 }
  0x46   : > { %448 = vmatpush.msra.mxu2 %v2733_v11  ;;  %379 = vmatpush.msra.mxu0 %v2725_v5  ;;  %v2749_v16 = vand.u32 4294901760, %v2733_v11  ;;  %v2752_v17 = vand.u32 4294901760, %v2737_v12  ;;  %v2755_v19 = vand.u32 4294901760, %v2741_v13  ;;  %v2822_v44 = vsub.f32 %v354_v37, %v2812_v40  ;;  %s2036_s10 = sshll.u32 %s2033_s29, 4  ;;  %s2037_s10 = int_to_ptr.hbm [resolvable:$true] %s2036_s10 }
  0x47   : > { %v358_v8 = vld [vmem:[#allocation2] sm:$0xff]  ;;  %479 = vmatpush.msra.mxu3 %v2725_v5  ;;  %v2759_v20 = vand.u32 4294901760, %v2744_v15  ;;  %v2806_v38 = vand.u32 4294901760, %v2799_v35  ;;  %v2819_v43 = vand.u32 4294901760, %v2809_v39  ;;  %v2837_v49 = vsub.f32 %v353_v41, %v2825_v45  ;;  %s2457_s12 = sshra.s32 %s2037_s10, 4  ;;  %s2458_s12 = int_to_ptr.hbm [resolvable:$true] %s2457_s12 }
  0x48   : > { %v362_v10 = vsel %vm360_vm1, %v358_v8, 0  ;;  %451 = vmatpush.msra.mxu2 %v2737_v12  ;;  %v408_v21 = vsub.f32 %v2733_v11, %v2749_v16  ;;  %381 = vmatpush.msra.mxu0 %v2727_v6  ;;  %v414_v22 = vsub.f32 %v2737_v12, %v2752_v17  ;;  %v420_v23 = vsub.f32 %v2741_v13, %v2755_v19  ;;  %s2459_s11 = scalar_lea.hbm %s2458_s12, 32  ;;  %p2464_p12 = scmp.lt.s32.totalorder %s2458_s12, %s3151_s5 }
  0x49   : > { %v384_v14 = vand.u32 4294901760, %v362_v10  ;;  %481 = vmatpush.msra.mxu3 %v2727_v6  ;;  %v426_v28 = vsub.f32 %v2744_v15, %v2759_v20  ;;  %v601_v42 = vsub.f32 %v2799_v35, %v2806_v38  ;;  %v607_v47 = vsub.f32 %v2809_v39, %v2819_v43  ;;  %p2460_p1 = scmp.ne.s32.totalorder %s2458_s12, %s2459_s11 }
  0x4a   : > { %v2770_v25 = vand.u32 4294901760, %v408_v21  ;;  %454 = vmatpush.msra.mxu2 %v2741_v13  ;;  %v2773_v26 = vand.u32 4294901760, %v414_v22  ;;  %383 = vmatpush.msra.mxu0 %v2729_v9  ;;  %v2782_v29 = vand.u32 4294901760, %v420_v23  ;;  %v2834_v48 = vand.u32 4294901760, %v2822_v44 }
  0x4b   : > { %v385_v18 = vsub.f32 %v362_v10, %v384_v14  ;;  %483 = vmatpush.msra.mxu3 %v2729_v9  ;;  %v2785_v31 = vand.u32 4294901760, %v426_v28  ;;  %v2829_v46 = vand.u32 4294901760, %v601_v42  ;;  %v2844_v50 = vand.u32 4294901760, %v607_v47  ;;  %p2461_p4 = pnand %p2460_p1, %p2664_p7 }
  0x4c   : > { %506 = vmatpush.msrb.mxu0 %v2749_v16  ;;  %410 = vmatpush.msra.mxu1 %v2770_v25  ;;  %v613_v51 = vsub.f32 %v2822_v44, %v2834_v48  ;;  %v2849_v52 = vand.u32 4294901760, %v2837_v49  ;;  %vm773_vm5 = vcmask 523264   ;;  %vm775_vm6 = vcmask 785408  }
  0x4d   : > { %v386_v24 = vand.u32 4294901760, %v385_v18  ;;  %457 = vmatpush.msra.mxu2 %v2744_v15  ;;  %603 = vmatpush.msrb.mxu3 %v2829_v46  ;;  %p2462_p10 = pneg %p2461_p4 }
  0x4e   : > { %460 = vmatmul.f32.vlgmr.msra.gmra.mxu2 %v385_v18  ;;  %416 = vmatpush.msra.mxu1 %v2773_v26  ;;  %v2855_v53 = vand.u32 4294901760, %v613_v51  ;;  %v619_v54 = vsub.f32 %v2837_v49, %v2849_v52 }
  0x4f   : > { %v387_v27 = vsub.f32 %v385_v18, %v386_v24  ;;  %487 = vmatmul.f32.vlgmr.msra.gmra.mxu3 %v386_v24  ;;  %510 = vmatpush.msrb.mxu0 %v2752_v17  ;;  %v2905_v24 = vld [vmem:[%s3150_s4] ss:$0 sm:$0xff] }
  0x50   : > { %422 = vmatpush.msra.mxu1 %v2782_v29  ;;  %570 = vmatpush.msrb.mxu2 %v2796_v33  ;;  %v2863_v55 = vand.u32 4294901760, %v619_v54 }
  0x51   : > { %v388_v30 = vand.u32 4294901760, %v387_v27  ;;  %514 = vmatpush.msrb.mxu0 %v2755_v19  ;;  %609 = vmatpush.msrb.mxu3 %v2844_v50 }
  0x52   : > { %428 = vmatpush.msra.mxu1 %v2785_v31  ;;  %572 = vmatpush.msrb.mxu2 %v2801_v36 }
  0x53   : > { %389 = vmatmul.f32.vlgmr.msra.gmra.mxu0 %v388_v30  ;;  %430 = vmatmul.f32.vlgmr.msra.gmra.mxu1 %v384_v14 }
  0x54   : > { %518 = vmatpush.msrb.mxu0 %v2759_v20  ;;  %537 = vmatpush.msrb.mxu1 %v2723_v4 }
  0x55   : > { %574 = vmatpush.msrb.mxu2 %v2812_v40  ;;  %615 = vmatpush.msrb.mxu3 %v2855_v53 }
  0x56   : > { %539 = vmatpush.msrb.mxu1 %v2725_v5  ;;  %641 = vmatpush.msra.mxu0 %v2799_v35 }
  0x57   : > { %576 = vmatpush.msrb.mxu2 %v2825_v45  ;;  %621 = vmatpush.msrb.mxu3 %v2863_v55 }
  0x58   : > { %541 = vmatpush.msrb.mxu1 %v2727_v6  ;;  %644 = vmatpush.msra.mxu0 %v2809_v39 }
  0x59   : > { %699 = vmatpush.msra.mxu2 %v2806_v38  ;;  %730 = vmatpush.msra.mxu3 %v2796_v33 }
  0x5a   : > { %543 = vmatpush.msrb.mxu1 %v2729_v9  ;;  %647 = vmatpush.msra.mxu0 %v2822_v44 }
  0x5b   : > { %520 = vmatmul.f32.vlgmr.msrb.gmra.mxu0 %v384_v14  ;;  %545 = vmatmul.f32.vlgmr.msrb.gmra.mxu1 %v384_v14 }
  0x5c   : > { %670 = vmatpush.msra.mxu1 %v2796_v33  ;;  %650 = vmatpush.msra.mxu0 %v2837_v49 }
  0x5d   : > { %703 = vmatpush.msra.mxu2 %v2819_v43  ;;  %732 = vmatpush.msra.mxu3 %v2801_v36 }
  0x5e   : > { %672 = vmatpush.msra.mxu1 %v2801_v36  ;;  %794 = vmatpush.msrb.mxu0 %v2723_v4 }
  0x5f   : > { %707 = vmatpush.msra.mxu2 %v2834_v48  ;;  %734 = vmatpush.msra.mxu3 %v2812_v40 }
  0x60   : > { %674 = vmatpush.msra.mxu1 %v2812_v40  ;;  %796 = vmatpush.msrb.mxu0 %v2725_v5 }
  0x61   : > { %711 = vmatpush.msra.mxu2 %v2849_v52  ;;  %736 = vmatpush.msra.mxu3 %v2825_v45 }
  0x62   : > { %676 = vmatpush.msra.mxu1 %v2825_v45  ;;  %798 = vmatpush.msrb.mxu0 %v2727_v6 }
  0x64   : > { %827 = vmatpush.msrb.mxu1 %v2770_v25  ;;  %800 = vmatpush.msrb.mxu0 %v2729_v9 }
  0x66   : > { %833 = vmatpush.msrb.mxu1 %v2773_v26 }
  0x68   : > { %839 = vmatpush.msrb.mxu1 %v2782_v29 }
  0x6a   : > { %845 = vmatpush.msrb.mxu1 %v2785_v31 }
  0xd0   : > { %v390_v56 = vpop.f32.mrf.mxu0  ;;  %v431_v57 = vpop.f32.mrf.mxu1 }
  0xd1   : > { %v461_v58 = vpop.f32.mrf.mxu2  ;;  %v432_v59 = vadd.f32 %v431_v57, %v390_v56 }
  0xd2   : > { %v488_v60 = vpop.f32.mrf.mxu3 }
  0xd3   : > { %v462_v61 = vadd.f32 %v461_v58, %v432_v59 }
  0xd5   : > { %v489_v63 = vadd.f32 %v488_v60, %v462_v61 }
  0xd8   : > { %v521_v62 = vpop.f32.mrf.mxu0  ;;  %v546_v2 = vpop.f32.mrf.mxu1 }
  0xd9   : > { %v522_v0 = vadd.f32 %v521_v62, %v489_v63 }
  0xdb   : > { %v547_v3 = vadd.f32 %v546_v2, %v522_v0 }
  0xdd   : > { %v549_v7 = vadd.f32 %v547_v3, %v359_v1 }
  0xdf   : > { %2299 = vtanh.f32 %v549_v7 }
  0xe5   : > { %v2300_v8 = vpop.eup %2299 }
  0xe6   : > { %v555_v10 = vsel %vm360_vm1, %v2300_v8, 0 }
  0xe7   : > { %v577_v14 = vand.u32 4294901760, %v555_v10 }
  0xe9   : > { %623 = vmatmul.f32.vlgmr.msrb.gmra.mxu3 %v577_v14  ;;  %v578_v18 = vsub.f32 %v555_v10, %v577_v14  ;;  %v757_v10 = vld [vmem:[%s2706_s6] sm:$0xff] }
  0xea   : > { %894 = vmatpush.msrb.mxu3 %v2723_v4 }
  0xeb   : > { %653 = vmatmul.f32.vlgmr.msra.gmra.mxu0 %v578_v18  ;;  %v579_v21 = vand.u32 4294901760, %v578_v18 }
  0xec   : > { %896 = vmatpush.msrb.mxu3 %v2725_v5  ;;  %923 = vmatpush.msra.mxu0 %v2749_v16 }
  0xed   : > { %680 = vmatmul.f32.vlgmr.msra.gmra.mxu1 %v579_v21  ;;  %v580_v22 = vsub.f32 %v578_v18, %v579_v21 }
  0xee   : > { %898 = vmatpush.msrb.mxu3 %v2727_v6  ;;  %954 = vmatpush.msra.mxu1 %v2723_v4 }
  0xef   : > { %v581_v23 = vand.u32 4294901760, %v580_v22  ;;  %927 = vmatpush.msra.mxu0 %v2752_v17 }
  0xf0   : > { %900 = vmatpush.msrb.mxu3 %v2729_v9  ;;  %956 = vmatpush.msra.mxu1 %v2725_v5 }
  0xf1   : > { %582 = vmatmul.f32.vlgmr.msrb.gmra.mxu2 %v581_v23  ;;  %738 = vmatmul.f32.vlgmr.msra.gmra.mxu3 %v577_v14 }
  0xf2   : > { %865 = vmatpush.msrb.mxu2 %v2733_v11  ;;  %958 = vmatpush.msra.mxu1 %v2727_v6 }
  0xf3   : > { %931 = vmatpush.msra.mxu0 %v2755_v19  ;;  %1017 = vmatpush.msra.mxu3 %v2829_v46 }
  0xf4   : > { %868 = vmatpush.msrb.mxu2 %v2737_v12  ;;  %960 = vmatpush.msra.mxu1 %v2729_v9 }
  0xf5   : > { %935 = vmatpush.msra.mxu0 %v2759_v20  ;;  %1023 = vmatpush.msra.mxu3 %v2844_v50 }
  0xf6   : > { %871 = vmatpush.msrb.mxu2 %v2741_v13 }
  0xf7   : > { %1029 = vmatpush.msra.mxu3 %v2855_v53 }
  0xf8   : > { %874 = vmatpush.msrb.mxu2 %v2744_v15 }
  0xf9   : > { %713 = vmatmul.f32.vlgmr.msra.gmra.mxu2 %v577_v14  ;;  %1035 = vmatpush.msra.mxu3 %v2863_v55 }
  0xfa   : > { %984 = vmatpush.msra.mxu2 %v2796_v33 }
  0xfc   : > { %986 = vmatpush.msra.mxu2 %v2801_v36 }
  0xfe   : > { %988 = vmatpush.msra.mxu2 %v2812_v40 }
 0x100   : > { %990 = vmatpush.msra.mxu2 %v2825_v45 }
 0x168   : > { %v654_v34 = vpop.f32.mrf.mxu0 }
 0x16a   : > { %v681_v41 = vpop.f32.mrf.mxu1 }
 0x16c   : > { %v624_v27 = vpop.f32.mrf.mxu3 }
 0x174   : > { %v583_v28 = vpop.f32.mrf.mxu2  ;;  %v739_v54 = vpop.f32.mrf.mxu3 }
 0x175   : > { %v584_v30 = vadd.f32 %v2905_v24, %v583_v28 }
 0x177   : > { %v625_v32 = vadd.f32 %v624_v27, %v584_v30 }
 0x179   : > { %v655_v37 = vadd.f32 %v654_v34, %v625_v32 }
 0x17b   : > { %v682_v42 = vadd.f32 %v681_v41, %v655_v37 }
 0x17c   : > { %v714_v47 = vpop.f32.mrf.mxu2 }
 0x17d   : > { %v715_v51 = vadd.f32 %v714_v47, %v682_v42 }
 0x17f   : > { %v2908_v56 = vadd.f32 %v739_v54, %v715_v51 }
 0x181   : > { %v743_v57 = vand.u32 2147483647, %v2908_v56  ;;  %v742_v7 = vmax.f32 %v2908_v56, 0.0 }
 0x183   : > { %v744_v58 = vsub.f32 0.0, %v743_v57 }
 0x185   : > { %v745_v59 = vmul.f32 1.442695, %v744_v58 }
 0x187   : > { %2301 = vpow2.f32 %v745_v59 }
 0x18d   : > { %v2302_v60 = vpop.eup %2301 }
 0x18e   : > { %v747_v61 = vadd.f32 1.0, %v2302_v60  ;;  %v750_v62 = vmul.f32 -0.5, %v2302_v60  ;;  %v753_v0 = vand.u32 2147483647, %v2302_v60 }
 0x190   : > { %2303 = vlog2.f32 %v747_v61  ;;  %v751_v63 = vadd.f32 1.0, %v750_v62  ;;  %vm754_vm2 = vcmp.lt.f32.partialorder %v753_v0, 0.0004427343  ;;  %v2185_v62 = vld [vmem:[%s2699_s13 + $0x8] sm:$0xff] }
 0x192   : > { %v752_v3 = vmul.f32 %v2302_v60, %v751_v63 }
 0x196   : > { %v2304_v1 = vpop.eup %2303 }
 0x197   : > { %v749_v2 = vmul.f32 0.6931472, %v2304_v1 }
 0x199   : > { %v755_v8 = vsel %vm754_vm2, %v752_v3, %v749_v2 }
 0x19a   : > { %v2913_v14 = vadd.f32 %v755_v8, %v742_v7 }
 0x19c   : > { %v758_v18 = vmul.f32 %v757_v10, %v2913_v14 }
 0x19e   : > { %760 = vrot.lane.b32.xlu0 %v758_v18, %s2544_s30 }
 0x210   : > { %v761_v21 = vpop.permute.xlu0 %760 }
 0x211   : > { %v763_v22 = vadd.f32 %v761_v21, %v2908_v56 }
 0x213   : > { %765 = vrot.lane.b32.xlu0 %v763_v22, %s2545_s7 }
 0x285   : > { %v2919_v23 = vpop.permute.xlu0 %765 }
 0x286   : > { %v779_v27 = vsel %vm360_vm1, %v2919_v23, 0 }
 0x287   : > { %v801_v28 = vand.u32 4294901760, %v779_v27 }
 0x289   : > { %v802_v30 = vsub.f32 %v779_v27, %v801_v28  ;;  %847 = vmatmul.f32.vlgmr.msrb.gmra.mxu1 %v801_v28 }
 0x28a   : > { %1084 = vmatpush.msrb.mxu1 %v2796_v33 }
 0x28b   : > { %v803_v32 = vand.u32 4294901760, %v802_v30  ;;  %877 = vmatmul.f32.vlgmr.msrb.gmra.mxu2 %v802_v30 }
 0x28c   : > { %1086 = vmatpush.msrb.mxu1 %v2801_v36  ;;  %1113 = vmatpush.msrb.mxu2 %v2806_v38 }
 0x28d   : > { %v804_v34 = vsub.f32 %v802_v30, %v803_v32  ;;  %904 = vmatmul.f32.vlgmr.msrb.gmra.mxu3 %v803_v32 }
 0x28e   : > { %1088 = vmatpush.msrb.mxu1 %v2812_v40  ;;  %1144 = vmatpush.msrb.mxu3 %v2796_v33 }
 0x28f   : > { %v805_v37 = vand.u32 4294901760, %v804_v34  ;;  %1117 = vmatpush.msrb.mxu2 %v2819_v43 }
 0x290   : > { %1090 = vmatpush.msrb.mxu1 %v2825_v45  ;;  %1146 = vmatpush.msrb.mxu3 %v2801_v36 }
 0x291   : > { %806 = vmatmul.f32.vlgmr.msrb.gmra.mxu0 %v805_v37  ;;  %962 = vmatmul.f32.vlgmr.msra.gmra.mxu1 %v801_v28 }
 0x292   : > { %1055 = vmatpush.msrb.mxu0 %v2799_v35  ;;  %1148 = vmatpush.msrb.mxu3 %v2812_v40 }
 0x293   : > { %1121 = vmatpush.msrb.mxu2 %v2834_v48  ;;  %1241 = vmatpush.msra.mxu1 %v2770_v25 }
 0x294   : > { %1058 = vmatpush.msrb.mxu0 %v2809_v39  ;;  %1150 = vmatpush.msrb.mxu3 %v2825_v45 }
 0x295   : > { %1125 = vmatpush.msrb.mxu2 %v2849_v52  ;;  %1247 = vmatpush.msra.mxu1 %v2773_v26 }
 0x296   : > { %1061 = vmatpush.msrb.mxu0 %v2822_v44 }
 0x297   : > { %1253 = vmatpush.msra.mxu1 %v2782_v29 }
 0x298   : > { %1064 = vmatpush.msrb.mxu0 %v2837_v49 }
 0x299   : > { %937 = vmatmul.f32.vlgmr.msra.gmra.mxu0 %v801_v28  ;;  %1259 = vmatpush.msra.mxu1 %v2785_v31 }
 0x29a   : > { %1208 = vmatpush.msra.mxu0 %v2723_v4 }
 0x29c   : > { %1210 = vmatpush.msra.mxu0 %v2725_v5 }
 0x29e   : > { %1212 = vmatpush.msra.mxu0 %v2727_v6 }
 0x2a0   : > { %1214 = vmatpush.msra.mxu0 %v2729_v9 }
 0x306   : > { %v848_v41 = vpop.f32.mrf.mxu1 }
 0x30e   : > { %v807_v42 = vpop.f32.mrf.mxu0  ;;  %v878_v51 = vpop.f32.mrf.mxu2 }
 0x30f   : > { %v849_v47 = vadd.f32 %v848_v41, %v807_v42  ;;  %v963_v61 = vpop.f32.mrf.mxu1 }
 0x310   : > { %v905_v57 = vpop.f32.mrf.mxu3 }
 0x311   : > { %v879_v54 = vadd.f32 %v878_v51, %v849_v47 }
 0x313   : > { %v906_v58 = vadd.f32 %v905_v57, %v879_v54 }
 0x316   : > { %v938_v59 = vpop.f32.mrf.mxu0 }
 0x317   : > { %v939_v60 = vadd.f32 %v938_v59, %v906_v58 }
 0x319   : > { %v964_v63 = vadd.f32 %v963_v61, %v939_v60 }
 0x31b   : > { %v966_v0 = vadd.f32 %v2185_v62, %v964_v63 }
 0x31d   : > { %2305 = vtanh.f32 %v966_v0 }
 0x323   : > { %v2306_v1 = vpop.eup %2305 }
 0x324   : > { %v969_v2 = vsel %vm360_vm1, %v2306_v1, 0 }
 0x325   : > { %v991_v3 = vand.u32 4294901760, %v969_v2 }
 0x327   : > { %1037 = vmatmul.f32.vlgmr.msra.gmra.mxu3 %v991_v3  ;;  %v992_v7 = vsub.f32 %v969_v2, %v991_v3 }
 0x328   : > { %1308 = vmatpush.msra.mxu3 %v2723_v4 }
 0x329   : > { %1067 = vmatmul.f32.vlgmr.msrb.gmra.mxu0 %v992_v7  ;;  %v993_v8 = vand.u32 4294901760, %v992_v7 }
 0x32a   : > { %1310 = vmatpush.msra.mxu3 %v2725_v5  ;;  %1337 = vmatpush.msrb.mxu0 %v2749_v16 }
 0x32b   : > { %1094 = vmatmul.f32.vlgmr.msrb.gmra.mxu1 %v993_v8  ;;  %v994_v10 = vsub.f32 %v992_v7, %v993_v8  ;;  %v2186_v8 = vld [vmem:[%s2706_s6 + $0x8] sm:$0xff] }
 0x32c   : > { %1312 = vmatpush.msra.mxu3 %v2727_v6  ;;  %1368 = vmatpush.msrb.mxu1 %v2723_v4 }
 0x32d   : > { %v995_v18 = vand.u32 4294901760, %v994_v10  ;;  %1341 = vmatpush.msrb.mxu0 %v2752_v17 }
 0x32e   : > { %1314 = vmatpush.msra.mxu3 %v2729_v9  ;;  %1370 = vmatpush.msrb.mxu1 %v2725_v5 }
 0x32f   : > { %996 = vmatmul.f32.vlgmr.msra.gmra.mxu2 %v995_v18  ;;  %1152 = vmatmul.f32.vlgmr.msrb.gmra.mxu3 %v991_v3 }
 0x330   : > { %1279 = vmatpush.msra.mxu2 %v2733_v11  ;;  %1372 = vmatpush.msrb.mxu1 %v2727_v6 }
 0x331   : > { %1345 = vmatpush.msrb.mxu0 %v2755_v19  ;;  %1431 = vmatpush.msrb.mxu3 %v2829_v46 }
 0x332   : > { %1282 = vmatpush.msra.mxu2 %v2737_v12  ;;  %1374 = vmatpush.msrb.mxu1 %v2729_v9 }
 0x333   : > { %1349 = vmatpush.msrb.mxu0 %v2759_v20  ;;  %1437 = vmatpush.msrb.mxu3 %v2844_v50 }
 0x334   : > { %1285 = vmatpush.msra.mxu2 %v2741_v13 }
 0x335   : > { %1443 = vmatpush.msrb.mxu3 %v2855_v53 }
 0x336   : > { %1288 = vmatpush.msra.mxu2 %v2744_v15 }
 0x337   : > { %1127 = vmatmul.f32.vlgmr.msrb.gmra.mxu2 %v991_v3  ;;  %1449 = vmatpush.msrb.mxu3 %v2863_v55 }
 0x338   : > { %1398 = vmatpush.msrb.mxu2 %v2796_v33 }
 0x33a   : > { %1400 = vmatpush.msrb.mxu2 %v2801_v36 }
 0x33c   : > { %1402 = vmatpush.msrb.mxu2 %v2812_v40 }
 0x33e   : > { %1404 = vmatpush.msrb.mxu2 %v2825_v45 }
 0x3a6   : > { %v1068_v30 = vpop.f32.mrf.mxu0 }
 0x3a8   : > { %v1095_v34 = vpop.f32.mrf.mxu1 }
 0x3aa   : > { %v1038_v21 = vpop.f32.mrf.mxu3 }
 0x3b2   : > { %v997_v22 = vpop.f32.mrf.mxu2  ;;  %v1153_v47 = vpop.f32.mrf.mxu3 }
 0x3b3   : > { %v998_v27 = vadd.f32 %v2905_v24, %v997_v22 }
 0x3b5   : > { %v1039_v28 = vadd.f32 %v1038_v21, %v998_v27 }
 0x3b7   : > { %v1069_v32 = vadd.f32 %v1068_v30, %v1039_v28 }
 0x3b9   : > { %v1096_v37 = vadd.f32 %v1095_v34, %v1069_v32 }
 0x3ba   : > { %v1128_v41 = vpop.f32.mrf.mxu2 }
 0x3bb   : > { %v1129_v42 = vadd.f32 %v1128_v41, %v1096_v37 }
 0x3bd   : > { %v2974_v51 = vadd.f32 %v1153_v47, %v1129_v42 }
 0x3bf   : > { %v1157_v54 = vand.u32 2147483647, %v2974_v51  ;;  %v1156_v3 = vmax.f32 %v2974_v51, 0.0 }
 0x3c1   : > { %v1158_v57 = vsub.f32 0.0, %v1157_v54 }
 0x3c3   : > { %v1159_v58 = vmul.f32 1.442695, %v1158_v57 }
 0x3c5   : > { %2307 = vpow2.f32 %v1159_v58 }
 0x3cb   : > { %v2308_v59 = vpop.eup %2307 }
 0x3cc   : > { %v1161_v60 = vadd.f32 1.0, %v2308_v59  ;;  %v1164_v61 = vmul.f32 -0.5, %v2308_v59  ;;  %v1167_v63 = vand.u32 2147483647, %v2308_v59 }
 0x3ce   : > { %2309 = vlog2.f32 %v1161_v60  ;;  %v1165_v62 = vadd.f32 1.0, %v1164_v61  ;;  %vm1168_vm3 = vcmp.lt.f32.partialorder %v1167_v63, 0.0004427343  ;;  %v2188_v61 = vld [vmem:[%s2699_s13 + $0x10] sm:$0xff] }
 0x3d0   : > { %v1166_v2 = vmul.f32 %v2308_v59, %v1165_v62 }
 0x3d4   : > { %v2310_v0 = vpop.eup %2309 }
 0x3d5   : > { %v1163_v1 = vmul.f32 0.6931472, %v2310_v0 }
 0x3d7   : > { %v1169_v7 = vsel %vm1168_vm3, %v1166_v2, %v1163_v1 }
 0x3d8   : > { %v2979_v10 = vadd.f32 %v1169_v7, %v1156_v3 }
 0x3da   : > { %v1173_v18 = vmul.f32 %v2186_v8, %v2979_v10 }
 0x3dc   : > { %1175 = vrot.lane.b32.xlu1 %v1173_v18, %s2544_s30 }
 0x44e   : > { %v1176_v21 = vpop.permute.xlu1 %1175 }
 0x44f   : > { %v1178_v22 = vadd.f32 %v1176_v21, %v2974_v51 }
 0x451   : > { %1180 = vrot.lane.b32.xlu1 %v1178_v22, %s2545_s7 }
 0x4c3   : > { %v2985_v27 = vpop.permute.xlu1 %1180 }
 0x4c4   : > { %v1193_v28 = vsel %vm360_vm1, %v2985_v27, 0 }
 0x4c5   : > { %v1215_v30 = vand.u32 4294901760, %v1193_v28 }
 0x4c7   : > { %v1216_v32 = vsub.f32 %v1193_v28, %v1215_v30  ;;  %1261 = vmatmul.f32.vlgmr.msra.gmra.mxu1 %v1215_v30 }
 0x4c8   : > { %1498 = vmatpush.msra.mxu1 %v2796_v33 }
 0x4c9   : > { %v1217_v34 = vand.u32 4294901760, %v1216_v32  ;;  %1291 = vmatmul.f32.vlgmr.msra.gmra.mxu2 %v1216_v32 }
 0x4ca   : > { %1500 = vmatpush.msra.mxu1 %v2801_v36  ;;  %1527 = vmatpush.msra.mxu2 %v2806_v38 }
 0x4cb   : > { %v1218_v37 = vsub.f32 %v1216_v32, %v1217_v34  ;;  %1318 = vmatmul.f32.vlgmr.msra.gmra.mxu3 %v1217_v34 }
 0x4cc   : > { %1502 = vmatpush.msra.mxu1 %v2812_v40  ;;  %1558 = vmatpush.msra.mxu3 %v2796_v33 }
 0x4cd   : > { %v1219_v41 = vand.u32 4294901760, %v1218_v37  ;;  %1531 = vmatpush.msra.mxu2 %v2819_v43 }
 0x4ce   : > { %1504 = vmatpush.msra.mxu1 %v2825_v45  ;;  %1560 = vmatpush.msra.mxu3 %v2801_v36 }
 0x4cf   : > { %1220 = vmatmul.f32.vlgmr.msra.gmra.mxu0 %v1219_v41  ;;  %1376 = vmatmul.f32.vlgmr.msrb.gmra.mxu1 %v1215_v30 }
 0x4d0   : > { %1469 = vmatpush.msra.mxu0 %v2799_v35  ;;  %1562 = vmatpush.msra.mxu3 %v2812_v40 }
 0x4d1   : > { %1535 = vmatpush.msra.mxu2 %v2834_v48  ;;  %1655 = vmatpush.msrb.mxu1 %v2770_v25 }
 0x4d2   : > { %1472 = vmatpush.msra.mxu0 %v2809_v39  ;;  %1564 = vmatpush.msra.mxu3 %v2825_v45 }
 0x4d3   : > { %1539 = vmatpush.msra.mxu2 %v2849_v52  ;;  %1661 = vmatpush.msrb.mxu1 %v2773_v26 }
 0x4d4   : > { %1475 = vmatpush.msra.mxu0 %v2822_v44 }
 0x4d5   : > { %1667 = vmatpush.msrb.mxu1 %v2782_v29 }
 0x4d6   : > { %1478 = vmatpush.msra.mxu0 %v2837_v49 }
 0x4d7   : > { %1351 = vmatmul.f32.vlgmr.msrb.gmra.mxu0 %v1215_v30  ;;  %1673 = vmatpush.msrb.mxu1 %v2785_v31 }
 0x4d8   : > { %1622 = vmatpush.msrb.mxu0 %v2723_v4 }
 0x4da   : > { %1624 = vmatpush.msrb.mxu0 %v2725_v5 }
 0x4dc   : > { %1626 = vmatpush.msrb.mxu0 %v2727_v6 }
 0x4de   : > { %1628 = vmatpush.msrb.mxu0 %v2729_v9 }
 0x544   : > { %v1262_v25 = vpop.f32.mrf.mxu1 }
 0x54c   : > { %v1221_v26 = vpop.f32.mrf.mxu0  ;;  %v1292_v47 = vpop.f32.mrf.mxu2 }
 0x54d   : > { %v1263_v42 = vadd.f32 %v1262_v25, %v1221_v26  ;;  %v1377_v60 = vpop.f32.mrf.mxu1  ;;  %v2189_v25 = vld [vmem:[%s2706_s6 + $0x10] sm:$0xff] }
 0x54e   : > { %v1319_v29 = vpop.f32.mrf.mxu3 }
 0x54f   : > { %v1293_v54 = vadd.f32 %v1292_v47, %v1263_v42 }
 0x551   : > { %v1320_v57 = vadd.f32 %v1319_v29, %v1293_v54 }
 0x554   : > { %v1352_v58 = vpop.f32.mrf.mxu0 }
 0x555   : > { %v1353_v59 = vadd.f32 %v1352_v58, %v1320_v57 }
 0x557   : > { %v1378_v31 = vadd.f32 %v1377_v60, %v1353_v59 }
 0x559   : > { %v1380_v62 = vadd.f32 %v2188_v61, %v1378_v31 }
 0x55b   : > { %2311 = vtanh.f32 %v1380_v62 }
 0x561   : > { %v2312_v63 = vpop.eup %2311 }
 0x562   : > { %v1383_v0 = vsel %vm360_vm1, %v2312_v63, 0 }
 0x563   : > { %v1405_v1 = vand.u32 4294901760, %v1383_v0 }
 0x565   : > { %1451 = vmatmul.f32.vlgmr.msrb.gmra.mxu3 %v1405_v1  ;;  %v1406_v2 = vsub.f32 %v1383_v0, %v1405_v1  ;;  %v2191_v0 = vld [vmem:[%s2699_s13 + $0x18] sm:$0xff]  ;;  %s2463_s13 = scalar_lea.hbm %s3151_s5, 64 }
 0x566   : > { %1722 = vmatpush.msrb.mxu3 %v2723_v4  ;;  %p2465_p13 = scmp.lt.s32.totalorder %s2463_s13, %s2459_s11 }
 0x567   : > { %1481 = vmatmul.f32.vlgmr.msra.gmra.mxu0 %v1406_v2  ;;  %v1407_v3 = vand.u32 4294901760, %v1406_v2 }
 0x568   : > { %1724 = vmatpush.msrb.mxu3 %v2725_v5  ;;  %1751 = vmatpush.msra.mxu0 %v2749_v16  ;;  %p2466_p0 = por %p2465_p13, %p2464_p12 }
 0x569   : > { %1508 = vmatmul.f32.vlgmr.msra.gmra.mxu1 %v1407_v3  ;;  %v1408_v7 = vsub.f32 %v1406_v2, %v1407_v3 }
 0x56a   : > { %1726 = vmatpush.msrb.mxu3 %v2727_v6  ;;  %1782 = vmatpush.msra.mxu1 %v2723_v4  ;;  %p2467_p3 = pnand %p2466_p0, %p2462_p10 }
 0x56b   : > { %v1409_v8 = vand.u32 4294901760, %v1408_v7  ;;  %1755 = vmatpush.msra.mxu0 %v2752_v17 }
 0x56c   : > { %1728 = vmatpush.msrb.mxu3 %v2729_v9  ;;  %1784 = vmatpush.msra.mxu1 %v2725_v5 }
 0x56d   : > { %1410 = vmatmul.f32.vlgmr.msrb.gmra.mxu2 %v1409_v8  ;;  %1566 = vmatmul.f32.vlgmr.msra.gmra.mxu3 %v1405_v1 }
 0x56e   : > { %1693 = vmatpush.msrb.mxu2 %v2733_v11  ;;  %1786 = vmatpush.msra.mxu1 %v2727_v6 }
 0x56f   : > { %1759 = vmatpush.msra.mxu0 %v2755_v19  ;;  %1845 = vmatpush.msra.mxu3 %v2829_v46 }
 0x570   : > { %1696 = vmatpush.msrb.mxu2 %v2737_v12  ;;  %1788 = vmatpush.msra.mxu1 %v2729_v9 }
 0x571   : > { %1763 = vmatpush.msra.mxu0 %v2759_v20  ;;  %1851 = vmatpush.msra.mxu3 %v2844_v50 }
 0x572   : > { %1699 = vmatpush.msrb.mxu2 %v2741_v13 }
 0x573   : > { %1857 = vmatpush.msra.mxu3 %v2855_v53 }
 0x574   : > { %1702 = vmatpush.msrb.mxu2 %v2744_v15 }
 0x575   : > { %1541 = vmatmul.f32.vlgmr.msra.gmra.mxu2 %v1405_v1  ;;  %1863 = vmatpush.msra.mxu3 %v2863_v55 }
 0x576   : > { %1812 = vmatpush.msra.mxu2 %v2796_v33 }
 0x578   : > { %1814 = vmatpush.msra.mxu2 %v2801_v36 }
 0x57a   : > { %1816 = vmatpush.msra.mxu2 %v2812_v40 }
 0x57c   : > { %1818 = vmatpush.msra.mxu2 %v2825_v45 }
 0x5e4   : > { %v1482_v11 = vpop.f32.mrf.mxu0 }
 0x5e6   : > { %v1509_v13 = vpop.f32.mrf.mxu1 }
 0x5e8   : > { %v1452_v4 = vpop.f32.mrf.mxu3 }
 0x5f0   : > { %v1411_v5 = vpop.f32.mrf.mxu2  ;;  %v1567_v19 = vpop.f32.mrf.mxu3 }
 0x5f1   : > { %v1412_v6 = vadd.f32 %v2905_v24, %v1411_v5 }
 0x5f3   : > { %v1453_v9 = vadd.f32 %v1452_v4, %v1412_v6 }
 0x5f5   : > { %v1483_v12 = vadd.f32 %v1482_v11, %v1453_v9 }
 0x5f7   : > { %v1510_v15 = vadd.f32 %v1509_v13, %v1483_v12 }
 0x5f8   : > { %v1542_v16 = vpop.f32.mrf.mxu2 }
 0x5f9   : > { %v1543_v17 = vadd.f32 %v1542_v16, %v1510_v15 }
 0x5fb   : > { %v3040_v20 = vadd.f32 %v1567_v19, %v1543_v17 }
 0x5fd   : > { %v1571_v46 = vand.u32 2147483647, %v3040_v20  ;;  %v1570_v37 = vmax.f32 %v3040_v20, 0.0 }
 0x5ff   : > { %v1572_v50 = vsub.f32 0.0, %v1571_v46 }
 0x601   : > { %v1573_v53 = vmul.f32 1.442695, %v1572_v50 }
 0x603   : > { %2313 = vpow2.f32 %v1573_v53 }
 0x609   : > { %v2314_v55 = vpop.eup %2313 }
 0x60a   : > { %v1575_v18 = vadd.f32 1.0, %v2314_v55  ;;  %v1578_v21 = vmul.f32 -0.5, %v2314_v55  ;;  %v1581_v28 = vand.u32 2147483647, %v2314_v55 }
 0x60c   : > { %2315 = vlog2.f32 %v1575_v18  ;;  %v1579_v22 = vadd.f32 1.0, %v1578_v21  ;;  %vm1582_vm4 = vcmp.lt.f32.partialorder %v1581_v28, 0.0004427343 }
 0x60e   : > { %v1580_v34 = vmul.f32 %v2314_v55, %v1579_v22 }
 0x612   : > { %v2316_v30 = vpop.eup %2315 }
 0x613   : > { %v1577_v32 = vmul.f32 0.6931472, %v2316_v30 }
 0x615   : > { %v1583_v41 = vsel %vm1582_vm4, %v1580_v34, %v1577_v32 }
 0x616   : > { %v3045_v26 = vadd.f32 %v1583_v41, %v1570_v37 }
 0x618   : > { %v1587_v42 = vmul.f32 %v2189_v25, %v3045_v26  ;;  %v2192_v25 = vld [vmem:[%s2706_s6 + $0x18] sm:$0xff] }
 0x61a   : > { %1589 = vrot.lane.b32.xlu2 %v1587_v42, %s2544_s30 }
 0x674   : > { %v1590_v47 = vpop.permute.xlu2 %1589 }
 0x675   : > { %v1592_v54 = vadd.f32 %v1590_v47, %v3040_v20 }
 0x677   : > { %1594 = vrot.lane.b32.xlu2 %v1592_v54, %s2545_s7 }
 0x67f   : > { %769 = vrot.lane.b32.xlu2 %v2913_v14, %s2546_s8  ;;  %v772_v14 = vsel %vm360_vm1, %v2919_v23, %v2908_v56 }
 0x6d1   : > { %v3053_v29 = vpop.permute.xlu2 %1594 }
 0x6d2   : > { %v1607_v57 = vsel %vm360_vm1, %v3053_v29, 0 }
 0x6d3   : > { %v1629_v58 = vand.u32 4294901760, %v1607_v57 }
 0x6d5   : > { %v1630_v59 = vsub.f32 %v1607_v57, %v1629_v58  ;;  %1675 = vmatmul.f32.vlgmr.msrb.gmra.mxu1 %v1629_v58 }
 0x6d6   : > { %1912 = vmatpush.msrb.mxu1 %v2796_v33 }
 0x6d7   : > { %v1631_v60 = vand.u32 4294901760, %v1630_v59  ;;  %1705 = vmatmul.f32.vlgmr.msrb.gmra.mxu2 %v1630_v59 }
 0x6d8   : > { %1914 = vmatpush.msrb.mxu1 %v2801_v36  ;;  %1941 = vmatpush.msrb.mxu2 %v2806_v38 }
 0x6d9   : > { %v1632_v61 = vsub.f32 %v1630_v59, %v1631_v60  ;;  %1732 = vmatmul.f32.vlgmr.msrb.gmra.mxu3 %v1631_v60  ;;  %v770_v31 = vpop.permute.xlu2 %769 }
 0x6da   : > { %v774_v62 = vsel %vm773_vm5, %v772_v14, %v770_v31  ;;  %1916 = vmatpush.msrb.mxu1 %v2812_v40  ;;  %1972 = vmatpush.msrb.mxu3 %v2796_v33 }
 0x6db   : > { %776 = vst.msk [vmem:[%s2720_s25] sm:$0xff] %vm775_vm6, %v774_v62  ;;  %v1633_v63 = vand.u32 4294901760, %v1632_v61  ;;  %1945 = vmatpush.msrb.mxu2 %v2819_v43 }
 0x6dc   : > { %1918 = vmatpush.msrb.mxu1 %v2825_v45  ;;  %1974 = vmatpush.msrb.mxu3 %v2801_v36 }
 0x6dd   : > { %1634 = vmatmul.f32.vlgmr.msrb.gmra.mxu0 %v1633_v63  ;;  %1790 = vmatmul.f32.vlgmr.msra.gmra.mxu1 %v1629_v58 }
 0x6de   : > { %1883 = vmatpush.msrb.mxu0 %v2799_v35  ;;  %1976 = vmatpush.msrb.mxu3 %v2812_v40 }
 0x6df   : > { %1949 = vmatpush.msrb.mxu2 %v2834_v48 }
 0x6e0   : > { %1886 = vmatpush.msrb.mxu0 %v2809_v39  ;;  %1978 = vmatpush.msrb.mxu3 %v2825_v45 }
 0x6e1   : > { %1953 = vmatpush.msrb.mxu2 %v2849_v52 }
 0x6e2   : > { %1889 = vmatpush.msrb.mxu0 %v2822_v44 }
 0x6e4   : > { %1892 = vmatpush.msrb.mxu0 %v2837_v49 }
 0x6e5   : > { %1765 = vmatmul.f32.vlgmr.msra.gmra.mxu0 %v1629_v58  ;;  %v1187_v58 = vsel %vm360_vm1, %v2985_v27, %v2974_v51  ;;  %v1601_v27 = vsel %vm360_vm1, %v3053_v29, %v3040_v20 }
 0x752   : > { %v1676_v33 = vpop.f32.mrf.mxu1 }
 0x75a   : > { %v1635_v36 = vpop.f32.mrf.mxu0  ;;  %v1706_v35 = vpop.f32.mrf.mxu2 }
 0x75b   : > { %v1677_v38 = vadd.f32 %v1676_v33, %v1635_v36  ;;  %v1791_v39 = vpop.f32.mrf.mxu1 }
 0x75c   : > { %v1733_v40 = vpop.f32.mrf.mxu3 }
 0x75d   : > { %v1707_v43 = vadd.f32 %v1706_v35, %v1677_v38 }
 0x75f   : > { %v1734_v56 = vadd.f32 %v1733_v40, %v1707_v43 }
 0x762   : > { %v1766_v48 = vpop.f32.mrf.mxu0 }
 0x763   : > { %v1767_v23 = vadd.f32 %v1766_v48, %v1734_v56 }
 0x765   : > { %v1792_v1 = vadd.f32 %v1791_v39, %v1767_v23 }
 0x767   : > { %v1794_v45 = vadd.f32 %v2191_v0, %v1792_v1 }
 0x769   : > { %2317 = vtanh.f32 %v1794_v45 }
 0x76f   : > { %v2318_v52 = vpop.eup %2317 }
 0x770   : > { %v1797_v44 = vsel %vm360_vm1, %v2318_v52, 0 }
 0x771   : > { %v1819_v2 = vand.u32 4294901760, %v1797_v44 }
 0x773   : > { %1865 = vmatmul.f32.vlgmr.msra.gmra.mxu3 %v1819_v2  ;;  %v1820_v49 = vsub.f32 %v1797_v44, %v1819_v2 }
 0x775   : > { %1895 = vmatmul.f32.vlgmr.msrb.gmra.mxu0 %v1820_v49  ;;  %v1821_v3 = vand.u32 4294901760, %v1820_v49 }
 0x777   : > { %1922 = vmatmul.f32.vlgmr.msrb.gmra.mxu1 %v1821_v3  ;;  %v1822_v7 = vsub.f32 %v1820_v49, %v1821_v3 }
 0x779   : > { %v1823_v8 = vand.u32 4294901760, %v1822_v7 }
 0x77b   : > { %1824 = vmatmul.f32.vlgmr.msra.gmra.mxu2 %v1823_v8  ;;  %1980 = vmatmul.f32.vlgmr.msrb.gmra.mxu3 %v1819_v2 }
 0x783   : > { %1955 = vmatmul.f32.vlgmr.msrb.gmra.mxu2 %v1819_v2 }
 0x7f2   : > { %v1896_v11 = vpop.f32.mrf.mxu0 }
 0x7f4   : > { %v1923_v13 = vpop.f32.mrf.mxu1 }
 0x7f6   : > { %v1866_v4 = vpop.f32.mrf.mxu3 }
 0x7fe   : > { %v1825_v5 = vpop.f32.mrf.mxu2  ;;  %v1981_v19 = vpop.f32.mrf.mxu3 }
 0x7ff   : > { %v1826_v6 = vadd.f32 %v2905_v24, %v1825_v5 }
 0x801   : > { %v1867_v9 = vadd.f32 %v1866_v4, %v1826_v6 }
 0x803   : > { %v1897_v12 = vadd.f32 %v1896_v11, %v1867_v9 }
 0x805   : > { %v1924_v15 = vadd.f32 %v1923_v13, %v1897_v12 }
 0x806   : > { %v1956_v16 = vpop.f32.mrf.mxu2 }
 0x807   : > { %v1957_v17 = vadd.f32 %v1956_v16, %v1924_v15 }
 0x809   : > { %v1982_v46 = vadd.f32 %v1981_v19, %v1957_v17 }
 0x80b   : > { %v1985_v50 = vand.u32 2147483647, %v1982_v46  ;;  %v1984_v37 = vmax.f32 %v1982_v46, 0.0 }
 0x80d   : > { %v1986_v53 = vsub.f32 0.0, %v1985_v50 }
 0x80f   : > { %v1987_v55 = vmul.f32 1.442695, %v1986_v53 }
 0x811   : > { %2319 = vpow2.f32 %v1987_v55 }
 0x817   : > { %v2320_v18 = vpop.eup %2319 }
 0x818   : > { %v1989_v21 = vadd.f32 1.0, %v2320_v18  ;;  %v1992_v22 = vmul.f32 -0.5, %v2320_v18  ;;  %v1995_v24 = vand.u32 2147483647, %v2320_v18 }
 0x81a   : > { %2321 = vlog2.f32 %v1989_v21  ;;  %v1993_v28 = vadd.f32 1.0, %v1992_v22  ;;  %vm1996_vm7 = vcmp.lt.f32.partialorder %v1995_v24, 0.0004427343 }
 0x81c   : > { %v1994_v34 = vmul.f32 %v2320_v18, %v1993_v28 }
 0x820   : > { %v2322_v30 = vpop.eup %2321 }
 0x821   : > { %v1991_v32 = vmul.f32 0.6931472, %v2322_v30 }
 0x823   : > { %v1997_v41 = vsel %vm1996_vm7, %v1994_v34, %v1991_v32 }
 0x824   : > { %v1998_v42 = vadd.f32 %v1997_v41, %v1984_v37 }
 0x826   : > { %2012 = vrot.lane.b32.xlu2 %v1998_v42, %s2546_s8  ;;  %v2001_v47 = vmul.f32 %v2192_v25, %v1998_v42 }
 0x828   : > { %2003 = vrot.lane.b32.xlu0 %v2001_v47, %s2544_s30 }
 0x830   : > { %1184 = vrot.lane.b32.xlu0 %v2979_v10, %s2546_s8 }
 0x880   : > { %v2013_v14 = vpop.permute.xlu2 %2012 }
 0x89a   : > { %v2004_v54 = vpop.permute.xlu0 %2003 }
 0x89b   : > { %v2006_v57 = vadd.f32 %v2004_v54, %v1982_v46 }
 0x89d   : > { %2008 = vrot.lane.b32.xlu1 %v2006_v57, %s2545_s7 }
 0x8a2   : > { %v1185_v59 = vpop.permute.xlu0 %1184 }
 0x8a3   : > { %v1188_v60 = vsel %vm773_vm5, %v1187_v58, %v1185_v59 }
 0x8a4   : > { %2187 = vst.msk [vmem:[%s2720_s25 + $0x8] sm:$0xff] %vm775_vm6, %v1188_v60 }
 0x8a5   : > { %1598 = vrot.lane.b32.xlu1 %v3045_v26, %s2546_s8 }
 0x90f   : > { %v2009_v10 = vpop.permute.xlu1 %2008 }
 0x910   : > { %v2015_v61 = vsel %vm360_vm1, %v2009_v10, %v1982_v46  ;;  %2019 = vst.msk [vmem:[#allocation2] sm:$0xff] %vm360_vm1, %v2009_v10 }
 0x911   : > { %v2016_v51 = vsel %vm773_vm5, %v2015_v61, %v2013_v14 }
 0x912   : > { %2193 = vst.msk [vmem:[%s2720_s25 + $0x18] sm:$0xff] %vm775_vm6, %v2016_v51 }
 0x917   : > { %v1599_v26 = vpop.permute.xlu1 %1598 }
 0x918   : > { %v1602_v31 = vsel %vm773_vm5, %v1601_v27, %v1599_v26 }
 0x919   : > { %2190 = vst.msk [vmem:[%s2720_s25 + $0x10] sm:$0xff] %vm775_vm6, %v1602_v31 }
 0x91a   : > { %2470 = shalt.err (!%p2467_p3)
}
 0x91b   : > { %s2547_s2 = smov 128   ;;  %s2548_s6 = smov 8  }
 0x91c   : > { %2214 = dma.vmem_to_hbm [thread:$0]  (%p2664_p7), %s2035_s17, 512, %s2037_s10, %s2021_s21, %s2547_s2, %s2547_s2, %s2548_s6  }
 0x91d PF: > { %s2051_s25 = sand.u32 1, %s2517_s18   ;;  %p2231_p5 = pnand %p2171_p11, %p2624_p6 }
 0x91e   : > { %s2052_s24 = scalar_lea.sflag [#allocation5], %s2051_s25 }
 0x91f   : > { %p2232_p9 = pneg %p2231_p5 }
 0x921   : > { %2512 = dma.done.wait (%p2232_p9), %s2052_s24, 512  }
 0x922   : > { %2514 = vsyncadd (%p2232_p9), %s2052_s24, 4294966784  ;;  %s25_s23 = sadd.s32 1, %s2537_s23   ;;  %s3174_s26 = sld [smem:[#allocation17_spill]] }
 0x923   : > { %p22_p2 = scmp.ge.s32.totalorder %s25_s23, 4   ;;  %s3175_s20 = sld [smem:[#allocation20_spill]] }
 0x924   : > { %s3176_s21 = sld [smem:[#allocation18_spill]]  ;;  %s3178_s18 = smov %s2521_s19 }
 0x925   : > { %s3177_s22 = sld [smem:[#allocation19_spill]]  ;;  %24 = sbr.rel (!%p22_p2) target bundleno = 12 (0xc), region = 119 }
 0x928   : > { %s3179_s19 = smov %s3174_s26 }
 0x92a   :  { %2058 = vsyncpa [#allocation4], 1 }
 0x92b   :  { %2060 = vsyncpa [#allocation4 + $0x1], 1 }
 0x92c   :  { %2061 = vsyncpa [#allocation7], 1 }
 0x92d   :  { %2063 = vsyncpa [#allocation7 + $0x1], 1 }
 0x92e   :  { %2064 = vsyncpa [#allocation10], 1 }
 0x92f   :  { %2065 = vsyncpa [#allocation5], 1 }
 0x930   :  { %2067 = vsyncpa [#allocation5 + $0x1], 1 }

</bundles_post_ra>
